<compile_context>
chip_gen: v6e
topology: v6e:2x2x1
jax: 0.10.0
libtpu: 0.0.40
codegen_flags: <defaults>
</compile_context>

<pallas_src>
import jax
import jax.numpy as jnp
from jax.experimental import pallas as pl
from jax.experimental.pallas import tpu as pltpu


def _round_up(n: int, m: int) -> int:
    return ((n + m - 1) // m) * m


def _max_tile_for_device() -> int:
    """1024 tiles on v7x (2 TC, 3.2 TB/s HBM); 512 elsewhere."""
    try:
        kind = jax.devices()[0].device_kind.lower()
    except Exception:
        return 512
    if "v7" in kind:
        return 1024
    return 512


def _transpose_kernel(x_ref, o_ref):
    # x_ref: (tT, tD) tile in VMEM ; o_ref: (tD, tT) tile in VMEM.
    # Pure XLU tile transpose; the kernel is HBM-bandwidth bound.
    o_ref[...] = x_ref[...].T


def transpose_module(x: jnp.ndarray, shape: tuple = (1, 2)) -> jnp.ndarray:
    """Equivalent of PyTorch `x.transpose(*shape)` for a 3-D (B, T, D) tensor,
    with the axis swap performed inside a Pallas TPU kernel."""
    assert x.ndim == 3, "kernel implemented for 3-D (B, T, D) inputs"
    axes = tuple(sorted(s % 3 for s in shape))
    assert axes == (1, 2), "kernel specialized for the (1, 2) swap used in Squeezeformer"

    B, T, D = x.shape
    itemsize = jnp.dtype(x.dtype).itemsize

    max_tile = _max_tile_for_device()
    # 128-multiple tiles (lane-dense unmasked stores on interior blocks),
    # capped at max_tile and at the 128-rounded dim (no oversized blocks for
    # tiny inputs). Edge blocks are handled by Pallas masking.
    tT = min(max_tile, _round_up(T, 128))
    tD = min(max_tile, _round_up(D, 128))

    nT = pl.cdiv(T, tT)
    nD = pl.cdiv(D, tD)

    # Lead with the T-tile axis (largest parallel extent when B is small) so
    # v7x's two TensorCores both get work.
    grid = (nT, B, nD)

    return pl.pallas_call(
        _transpose_kernel,
        out_shape=jax.ShapeDtypeStruct((B, D, T), x.dtype),
        grid=grid,
        in_specs=[
            pl.BlockSpec((pl.Squeezed(), tT, tD), lambda t, b, d: (b, t, d)),
        ],
        out_specs=pl.BlockSpec((pl.Squeezed(), tD, tT), lambda t, b, d: (b, d, t)),
        compiler_params=pltpu.CompilerParams(
            dimension_semantics=("parallel", "parallel", "parallel"),
        ),
        cost_estimate=pl.CostEstimate(
            flops=0,
            transcendentals=0,
            bytes_accessed=2 * B * T * D * itemsize,
        ),
    )(x)


def _check(B, T, D, key):
    x = jax.random.normal(key, (B, T, D), dtype=jnp.float32)
    y = jax.block_until_ready(transpose_module(x, shape=(1, 2)))
    ref = jnp.swapaxes(x, 1, 2)
    assert y.shape == (B, D, T), y.shape
    assert jnp.array_equal(y, ref), f"mismatch vs reference transpose for {(B, T, D)}"


if __name__ == "__main__":
    key = jax.random.PRNGKey(0)
    k0, k1 = jax.random.split(key)

    # Small shape consistent with the module (batch=2, seq=16, hidden=32).
    _check(2, 16, 32, k0)

    # Non-128-aligned shape to exercise masked edge blocks on both axes.
    _check(1, 200, 144, k1)

    print("KERNEL_OK")
</pallas_src>

<mosaic_0001>
module attributes {stable_mosaic.version = 11 : i64} {
  func.func @_transpose_kernel(%arg0: i32, %arg1: i32, %arg2: i32, %arg3: memref<1x128x128xf32, #tpu.memory_space<vmem>>, %arg4: memref<1x128x128xf32, #tpu.memory_space<vmem>>) attributes {dimension_semantics = [#tpu.dimension_semantics<parallel>, #tpu.dimension_semantics<parallel>, #tpu.dimension_semantics<parallel>], iteration_bounds = array<i64: 1, 2, 1>, scalar_prefetch = 0 : i64, scratch_operands = 0 : i64, tpu.core_type = #tpu.core_type<tc>, window_params = [{transform_indices = @transform_0, window_bounds = array<i64: 1, 128, 128>}, {transform_indices = @transform_1, window_bounds = array<i64: 1, 128, 128>}]} {
    %c0 = arith.constant 0 : index
    %c0_0 = arith.constant 0 : index
    %c0_1 = arith.constant 0 : index
    %0 = vector.load %arg3[%c0, %c0_0, %c0_1] : memref<1x128x128xf32, #tpu.memory_space<vmem>>, vector<1x128x128xf32>
    %1 = vector.shape_cast %0 : vector<1x128x128xf32> to vector<128x128xf32>
    %2 = tpu.transpose %1, [1, 0] : vector<128x128xf32> -> vector<128x128xf32>
    %c0_2 = arith.constant 0 : index
    %c0_3 = arith.constant 0 : index
    %c0_4 = arith.constant 0 : index
    %3 = vector.load %arg4[%c0_2, %c0_3, %c0_4] : memref<1x128x128xf32, #tpu.memory_space<vmem>>, vector<1x128x128xf32>
    %4 = vector.shape_cast %3 : vector<1x128x128xf32> to vector<128x128xf32>
    %5 = vector.shape_cast %2 : vector<128x128xf32> to vector<1x128x128xf32>
    tpu.vector_store %arg4[%c0_2, %c0_3, %c0_4], %5 {strides = array<i32>} : memref<1x128x128xf32, #tpu.memory_space<vmem>>, vector<1x128x128xf32>,
    return
  }
  func.func @transform_0(%arg0: i32, %arg1: i32, %arg2: i32) -> (i32, i32, i32) {
    %c0_i32 = arith.constant 0 : i32
    return %arg1, %arg0, %arg2 : i32, i32, i32
  }
  func.func @transform_1(%arg0: i32, %arg1: i32, %arg2: i32) -> (i32, i32, i32) {
    %c0_i32 = arith.constant 0 : i32
    return %arg1, %arg2, %arg0 : i32, i32, i32
  }
}

</mosaic_0001>

<bundles_post_ra>
// kernel: tpu_custom_call.1
= control target key start
LH: loop header
LB: loop body
LE: loop exit
PB: predicated region body
PF: predicated region fallthrough
CT: control target
= control target key end

     0   :  { %6 = vsyncpa [#allocation3], 0  ;;  %s828_s0 = inlined_call_operand.hbm [shape: f32[2,16,32], index: 0, kind: input, shape index: {}]   ;;  %s829_s1 = inlined_call_operand.vmem [shape: f32[2,32,16], index: 1, kind: output, shape index: {}]  }
   0x1   :  { %8 = vsyncpa [#allocation3 + $0x1], 0  ;;  %s709_s6 = smov 0   ;;  %s711_s7 = smov 0  }
   0x2   :  { %s713_s8 = smov 0   ;;  %s715_s9 = smov 0  }
   0x3   :  { %s717_s10 = smov 0   ;;  %s719_s11 = smov 0  }
   0x4 LB: > { %s494_s12 = sadd.s32 4294967295, %s690_s11   ;;  %s29_s13 = sadd.s32 1, %s686_s10  ;;  %s690_s11 = sphi %s719_s11, %s14_s11   ;;  %s686_s10 = sphi %s717_s10, %s836_s10   ;;  %s682_s9 = sphi %s715_s9, %s835_s9   ;;  %s678_s8 = sphi %s713_s8, %s834_s8   ;;  %s674_s7 = sphi %s711_s7, %s833_s7   ;;  %s670_s6 = sphi %s709_s6, %s832_s6  }
   0x5   : > { %p31_p0 = scmp.ge.s32.totalorder %s29_s13, 2  ;;  %s44_s14 = sadd.s32 1, %s678_s8 }
   0x6   : > { %p51_p1 = scmp.ne.s32.totalorder %s678_s8, %s674_s7  ;;  %p52_p2 = scmp.eq.s32.totalorder %s690_s11, 0 }
   0x7   : > { %s838_s13 = smov (%p31_p0, %s29_s13), 0  ;;  %p57_p4 = scmp.ne.s32.totalorder %s674_s7, %s670_s6 }
   0x8   : > { %p53_p3 = por %p52_p2, %p51_p1  ;;  %s37_s15 = ssub.s32 %s686_s10, %s838_s13 }
   0x9   : > { %p58_p5 = scmp.eq.s32.totalorder %s494_s12, 0  ;;  %p42_p6 = scmp.eq.s32.totalorder %s37_s15, 0 }
   0xa   : > { %p85_p7 = scmp.eq.s32.totalorder %s494_s12, 1  ;;  %p497_p10 = scmp.ge.s32.totalorder %s690_s11, 2 }
   0xb   : > { %p748_p8 = por %p58_p5, %p57_p4 }
   0xc   : > { %s753_s17 = scalar_select %p42_p6, %s678_s8, %s44_s14  }
   0xd   : > { %p755_p9 = por %p85_p7, %p51_p1  ;;  %107 = sbr.rel (%p497_p10) target bundleno = 37 (0x25), region = 16 }
  0x12   : > { %110 = sbr.rel (!%p53_p3) target bundleno = 37 (0x25), region = 20  ;;  %s111_s19 = sand.u32 (%p53_p3), 1, %s678_s8  }
  0x13   : > { %s498_s20 = sshll.u32 (%p53_p3), %s111_s19, 7  ;;  %s112_s21 = scalar_lea.sflag (%p53_p3), [#allocation3], %s111_s19 }
  0x14   : > { %s115_s22 = scalar_lea.vmem (%p53_p3), [#allocation2], %s498_s20 }
  0x17   : > { %121 = vsyncadd %s112_s21, 1792  ;;  %s517_s23 = sshll.u32 %s686_s10, 8  ;;  %s129_s24 = sshll.u32 %s115_s22, 4  ;;  %s130_s24 = int_to_ptr.vmem [resolvable:$true] %s129_s24 }
  0x18   : > { %s127_s27 = scalar_lea.hbm %s828_s0, %s517_s23  ;;  %s612_s28 = scalar_lea.vmem %s130_s24, 256 }
  0x19   : > { %p613_p11 = scmp.ne.s32.totalorder %s130_s24, %s612_s28  ;;  %s696_s29 = smov [#allocation2]  }
  0x1a   : > { %s614_s30 = sshll.u32 %s696_s29, 4  ;;  %s615_s30 = int_to_ptr.vmem [resolvable:$false] %s614_s30 }
  0x1b   : > { %s616_s2 = scalar_lea.vmem %s615_s30, 4096  ;;  %p617_p12 = scmp.lt.s32.totalorder %s130_s24, %s615_s30 }
  0x1c   : > { %p618_p13 = scmp.lt.s32.totalorder %s616_s2, %s612_s28 }
  0x1e   : > { %p619_p0 = por %p618_p13, %p617_p12 }
  0x20   : > { %p620_p1 = pnand %p619_p0, %p613_p11 }
  0x22   : > { %623 = shalt.err (!%p620_p1)
}
  0x23   : > { %s697_s3 = smov 128   ;;  %s698_s4 = smov 8  }
  0x24   : > { %135 = dma.hbm_to_vmem [thread:$0]  %s127_s27, 256, %s130_s24, %s112_s21, %s697_s3, %s697_s3, %s698_s4  }
  0x25 PF: > { %p501_p2 = scmp.ge.s32.totalorder %s690_s11, 1  ;;  %p137_p3 = scmp.lt.s32.totalorder %s690_s11, 3 }
  0x27   : > { %p138_p4 = pnand %p501_p2, %p137_p3 }
  0x28   : > { %s143_s5 = sand.u32 (!%p138_p4), 1, %s674_s7  }
  0x29   : > { %141 = sbr.rel (%p138_p4) target bundleno = 241 (0xf1), region = 24  ;;  %s768_s6 = sshll.u32 (!%p138_p4), %s143_s5, 7 }
  0x2a   : > { %s144_s12 = scalar_lea.sflag (!%p138_p4), [#allocation3], %s143_s5  ;;  %s771_s14 = scalar_lea.vmem (!%p138_p4), [#allocation2], %s768_s6 }
  0x2e   : > { %665 = dma.done.wait (%p748_p8), %s144_s12, 2048  }
  0x2f   : > { %667 = vsyncadd (%p748_p8), %s144_s12, 4294965248  ;;  %v171_v0 = vld [vmem:[%s771_s14] sm:$0xff]  ;;  %v172_v1 = vld [vmem:[%s771_s14 + $0x8] sm:$0xff]  ;;  %s794_s15 = scalar_lea.vmem [#allocation4], %s768_s6   ;;  %s518_s16 = sshll.u32 (%p755_p9), %s682_s9, 5 }
  0x30   : > { %187 = vxpose.xlu0.b32.start [1/16] %v171_v0, 128  ;;  %v173_v2 = vld [vmem:[%s771_s14 + $0x10] sm:$0xff]  ;;  %v174_v3 = vld [vmem:[%s771_s14 + $0x18] sm:$0xff]  ;;  %v175_v4 = vld [vmem:[%s771_s14 + $0x20] sm:$0xff]  ;;  %s250_s21 = scalar_lea.vmem (%p755_p9), %s829_s1, %s518_s16   ;;  %s692_s22 = smov (%p755_p9), 0  }
  0x31   : > { %v176_v5 = vld [vmem:[%s771_s14 + $0x28] sm:$0xff]  ;;  %v177_v6 = vld [vmem:[%s771_s14 + $0x30] sm:$0xff]  ;;  %v178_v7 = vld [vmem:[%s771_s14 + $0x38] sm:$0xff] }
  0x32   : > { %v179_v8 = vld [vmem:[%s771_s14 + $0x40] sm:$0xff]  ;;  %v180_v9 = vld [vmem:[%s771_s14 + $0x48] sm:$0xff]  ;;  %v181_v10 = vld [vmem:[%s771_s14 + $0x50] sm:$0xff] }
  0x33   : > { %v182_v11 = vld [vmem:[%s771_s14 + $0x58] sm:$0xff]  ;;  %v183_v12 = vld [vmem:[%s771_s14 + $0x60] sm:$0xff]  ;;  %v184_v13 = vld [vmem:[%s771_s14 + $0x68] sm:$0xff] }
  0x34   : > { %188 = vxpose.xlu0.b32.cont [2/16] %v172_v1, 128  ;;  %v185_v14 = vld [vmem:[%s771_s14 + $0x70] sm:$0xff]  ;;  %v186_v15 = vld [vmem:[%s771_s14 + $0x78] sm:$0xff] }
  0x38   : > { %189 = vxpose.xlu0.b32.cont [3/16] %v173_v2, 128 }
  0x3c   : > { %190 = vxpose.xlu0.b32.cont [4/16] %v174_v3, 128 }
  0x40   : > { %191 = vxpose.xlu0.b32.cont [5/16] %v175_v4, 128 }
  0x44   : > { %192 = vxpose.xlu0.b32.cont [6/16] %v176_v5, 128 }
  0x48   : > { %193 = vxpose.xlu0.b32.cont [7/16] %v177_v6, 128 }
  0x4c   : > { %194 = vxpose.xlu0.b32.cont [8/16] %v178_v7, 128 }
  0x50   : > { %195 = vxpose.xlu0.b32.cont [9/16] %v179_v8, 128 }
  0x54   : > { %196 = vxpose.xlu0.b32.cont [10/16] %v180_v9, 128 }
  0x58   : > { %197 = vxpose.xlu0.b32.cont [11/16] %v181_v10, 128 }
  0x5c   : > { %198 = vxpose.xlu0.b32.cont [12/16] %v182_v11, 128 }
  0x60   : > { %199 = vxpose.xlu0.b32.cont [13/16] %v183_v12, 128 }
  0x64   : > { %200 = vxpose.xlu0.b32.cont [14/16] %v184_v13, 128 }
  0x68   : > { %201 = vxpose.xlu0.b32.cont [15/16] %v185_v14, 128 }
  0x6c   : > { %202 = vxpose.xlu0.b32.end [16/16] %v186_v15, 128 }
  0xac   : > { %v203_v16 = vpop.trf.xlu0 }
  0xad   : > { %219 = vst [vmem:[%s794_s15] sm:$0xff] %v203_v16 }
  0xb0   : > { %v204_v17 = vpop.trf.xlu0 }
  0xb1   : > { %220 = vst [vmem:[%s794_s15 + $0x8] sm:$0xff] %v204_v17 }
  0xb4   : > { %v205_v18 = vpop.trf.xlu0 }
  0xb5   : > { %221 = vst [vmem:[%s794_s15 + $0x10] sm:$0xff] %v205_v18 }
  0xb8   : > { %v206_v19 = vpop.trf.xlu0 }
  0xb9   : > { %222 = vst [vmem:[%s794_s15 + $0x18] sm:$0xff] %v206_v19 }
  0xbc   : > { %v207_v20 = vpop.trf.xlu0 }
  0xc0   : > { %v208_v21 = vpop.trf.xlu0 }
  0xc4   : > { %v209_v22 = vpop.trf.xlu0 }
  0xc8   : > { %v210_v23 = vpop.trf.xlu0 }
  0xcc   : > { %v211_v24 = vpop.trf.xlu0 }
  0xd0   : > { %v212_v25 = vpop.trf.xlu0 }
  0xd4   : > { %v213_v26 = vpop.trf.xlu0 }
  0xd8   : > { %v214_v27 = vpop.trf.xlu0 }
  0xdc   : > { %v215_v28 = vpop.trf.xlu0 }
  0xe0   : > { %v216_v29 = vpop.trf.xlu0 }
  0xe4   : > { %v217_v30 = vpop.trf.xlu0  ;;  %241 = sbr.rel (!%p755_p9) target bundleno = 241 (0xf1), region = 32 }
  0xe8   : > { %v218_v31 = vpop.trf.xlu0 }
  0xe9 LB: >> { %v322_v32 = vld [vmem:[%s794_s15] sm:$0xff]  ;;  %v324_v33 = vld [vmem:[%s794_s15 + $0x8] sm:$0xff]  ;;  %v326_v34 = vld [vmem:[%s794_s15 + $0x10] sm:$0xff]  ;;  %s316_s22 = sadd.s32 1, %s694_s22   ;;  %s694_s22 = sphi %s692_s22, %s316_s22  }
  0xea   : >> { %323 = vst [vmem:[%s250_s21] sm:$0xff] %v322_v32  ;;  %325 = vst [vmem:[%s250_s21 + $0x8] sm:$0xff] %v324_v33  ;;  %v328_v35 = vld [vmem:[%s794_s15 + $0x18] sm:$0xff]  ;;  %p315_p5 = scmp.ge.s32.totalorder %s316_s22, 1 }
  0xeb   : >> { %327 = vst [vmem:[%s250_s21 + $0x10] sm:$0xff] %v326_v34  ;;  %329 = vst [vmem:[%s250_s21 + $0x18] sm:$0xff] %v328_v35 }
  0xec   : > { %318 = sbr.rel (!%p315_p5) target bundleno = 233 (0xe9), region = 124 }
  0xf1 PF: > { %s14_s11 = sadd.s32 1, %s690_s11   ;;  %s832_s6 = smov %s674_s7 }
  0xf2   : > { %p11_p6 = scmp.ge.s32.totalorder %s14_s11, 4   ;;  %s833_s7 = smov %s678_s8 }
  0xf3   : > { %s834_s8 = smov %s753_s17  ;;  %s835_s9 = smov %s686_s10 }
  0xf4   : > { %s836_s10 = smov %s838_s13  ;;  %13 = sbr.rel (!%p11_p6) target bundleno = 4 (0x4), region = 146 }
  0xf9   :  { %377 = vsyncpa [#allocation3], 1 }
  0xfa   :  { %379 = vsyncpa [#allocation3 + $0x1], 1 }

</bundles_post_ra>
